<compile_context>
chip_gen: v5e
topology: v5e:2x2
jax: 0.10.0
libtpu: 0.0.40
codegen_flags: <defaults>
</compile_context>

<pallas_src>
import functools

import jax
import jax.numpy as jnp
from jax import lax
from jax.experimental import pallas as pl
from jax.experimental.pallas import tpu as pltpu

_LANES = 128


def _device_kind() -> str:
    try:
        return jax.devices()[0].device_kind.lower()
    except Exception:  # defensive: fall back to the safest defaults
        return ""


def _default_num_cores(kind: str) -> int:
    # v7x has 2 TensorCores per chip; v5e/v6e (and unknown chips) have 1.
    return 2 if "v7" in kind else 1


def _default_tile_rows(kind: str) -> int:
    # 8192 x 128 f32 blocks = 4 MiB -> 16 MiB of double-buffered inputs, which
    # fits the 32 MiB scoped-VMEM default on v6e/v7x.  v5e's default is 16 MiB,
    # so stay at 4096 (8 MiB) there and on unknown chips.
    if "v6" in kind or "v7" in kind:
        return 8192
    return 4096


def _mse_partial_kernel(p_ref, a_ref, o_ref, acc_ref, *,
                        rows_total, tile_rows, blocks_per_core, mask_from):
    c = pl.program_id(0)   # "core" axis (parallel)
    i = pl.program_id(1)   # reduction axis (arbitrary)

    @pl.when(i == 0)
    def _():
        acc_ref[...] = jnp.zeros_like(acc_ref)

    d = p_ref[...].astype(jnp.float32) - a_ref[...].astype(jnp.float32)
    d2 = d * d

    def fold(x):
        # (tile_rows, 128) -> (8, 128).  The reshape groups whole (8, 128) f32
        # vreg tiles (layout-free) and the leading-axis sum is pure VALU vreg
        # adds (no XLU), feeding the tiny resident accumulator.
        return jnp.sum(x.reshape(tile_rows // 8, 8, _LANES), axis=0)

    if mask_from is None:
        # Every block is fully valid: unmasked fast path on all steps.
        acc_ref[...] += fold(d2)
    else:
        blk = c * blocks_per_core + i   # logical (unclamped) block id

        @pl.when(blk < mask_from)
        def _():                         # interior blocks: no mask work at all
            acc_ref[...] += fold(d2)

        @pl.when(blk >= mask_from)
        def _():                         # ragged last block / clamped duplicates
            row_ids = blk * tile_rows + lax.broadcasted_iota(
                jnp.int32, (tile_rows, _LANES), 0)
            d2m = jnp.where(row_ids < rows_total, d2, 0.0)
            acc_ref[...] += fold(d2m)

    # Single cross-lane/sublane reduce + scalar store, only on the last step.
    @pl.when(i == pl.num_programs(1) - 1)
    def _():
        o_ref[0, 0] = jnp.sum(acc_ref[...])


def mse_loss(pred, actual, *, tile_rows=None, num_cores=None):
    assert pred.shape == actual.shape, "MSELoss requires matching shapes"
    total_n = int(pred.size)
    assert total_n > 0

    kind = _device_kind()
    if tile_rows is None:
        tile_rows = _default_tile_rows(kind)
    if num_cores is None:
        num_cores = _default_num_cores(kind)

    itemsize = jnp.dtype(pred.dtype).itemsize
    # Minimum sublane multiple for packed dtypes: f32 -> 8, bf16 -> 16, int8 -> 32.
    min_sub = max(8, 32 // itemsize)

    p = pred.reshape(-1)      # free reshape of contiguous operands
    a = actual.reshape(-1)

    rows = total_n // _LANES          # full 128-lane rows
    tail = total_n - rows * _LANES    # < 128 ragged elements

    # Inputs smaller than one (min_sub, 128) tile: not worth a kernel launch.
    if rows < min_sub:
        d = p.astype(jnp.float32) - a.astype(jnp.float32)
        return jnp.sum(d * d) / jnp.float32(total_n)

    # Ragged lane tail (< 128 elements): tiny jnp reduction in the wrapper
    # instead of jnp.pad-ing (and re-copying) the whole operands through HBM.
    if tail:
        dt = (p[rows * _LANES:].astype(jnp.float32)
              - a[rows * _LANES:].astype(jnp.float32))
        tail_sum = jnp.sum(dt * dt)
        p_main = p[: rows * _LANES]
        a_main = a[: rows * _LANES]
    else:
        tail_sum = jnp.float32(0.0)
        p_main = p
        a_main = a

    p2 = p_main.reshape(rows, _LANES)
    a2 = a_main.reshape(rows, _LANES)

    # Block height: multiple of the dtype's sublane minimum, as large as the
    # per-chip target allows, never larger than the row count.
    target = max(min_sub, (int(tile_rows) // min_sub) * min_sub)
    tr = min(target, (rows // min_sub) * min_sub)

    n_blocks = -(-rows // tr)
    blocks_per_core = -(-n_blocks // num_cores)
    grid = (num_cores, blocks_per_core)

    last_ragged = (rows % tr) != 0
    has_dup = num_cores * blocks_per_core > n_blocks
    if last_ragged:
        mask_from = n_blocks - 1          # mask the partial last block (+ dups)
    elif has_dup:
        mask_from = n_blocks              # mask only clamped duplicate blocks
    else:
        mask_from = None                  # every block fully valid: never mask

    if num_cores == 1:
        def in_map(c, i):
            return (i, 0)
    else:
        def in_map(c, i):
            blk = c * blocks_per_core + i
            # Clamp so duplicate blocks handed to an idle core stay in bounds;
            # the kernel masks them out using the *logical* block id.
            return (jnp.minimum(blk, n_blocks - 1), 0)

    # Bytes actually streamed: both (rows, 128) operands once, plus one
    # duplicate-block re-read per idle-core step, plus the scalar outputs.
    dup_steps = num_cores * blocks_per_core - n_blocks
    bytes_accessed = (2 * rows * _LANES * itemsize
                      + 2 * dup_steps * tr * _LANES * itemsize
                      + 4 * num_cores)
    cost = pl.CostEstimate(flops=3 * rows * _LANES, transcendentals=0,
                           bytes_accessed=bytes_accessed)

    partials = pl.pallas_call(
        functools.partial(
            _mse_partial_kernel,
            rows_total=rows,
            tile_rows=tr,
            blocks_per_core=blocks_per_core,
            mask_from=mask_from,
        ),
        out_shape=jax.ShapeDtypeStruct((num_cores, 1), jnp.float32),
        grid_spec=pltpu.PrefetchScalarGridSpec(
            num_scalar_prefetch=0,
            grid=grid,
            in_specs=[
                pl.BlockSpec((tr, _LANES), in_map),
                pl.BlockSpec((tr, _LANES), in_map),
            ],
            # One scalar partial sum per core, written once per core.
            out_specs=pl.BlockSpec((1, 1), lambda c, i: (c, 0),
                                   memory_space=pltpu.SMEM),
            # Tiny (8, 128) f32 accumulator, resident across the reduction axis.
            scratch_shapes=[pltpu.VMEM((8, _LANES), jnp.float32)],
        ),
        compiler_params=pltpu.CompilerParams(
            dimension_semantics=("parallel", "arbitrary"),
            # On the ragged path let XLA fuse the prefix-slice producers into
            # the pallas_call inputs instead of materializing copies in HBM.
            allow_input_fusion=[True, True] if tail else None,
        ),
        cost_estimate=cost,
    )(p2, a2)

    # Combine per-core partial sums + lane tail; apply the mean in the wrapper.
    return (jnp.sum(partials) + tail_sum) / jnp.float32(total_n)


if __name__ == "__main__":
    key = jax.random.PRNGKey(0)
    k1, k2, k3, k4, k5, k6 = jax.random.split(key, 6)

    # Small NCHW-shaped inputs, consistent with an image-regression use of MSE.
    pred = jax.random.normal(k1, (2, 4, 16, 16), dtype=jnp.float32)
    actual = jax.random.normal(k2, (2, 4, 16, 16), dtype=jnp.float32)
    loss = mse_loss(pred, actual)
    jax.block_until_ready(loss)
    ref = jnp.mean((pred - actual) ** 2)
    assert jnp.allclose(loss, ref, rtol=1e-5, atol=1e-6), (loss, ref)

    # Ragged (non-multiple-of-128) element count: wrapper lane-tail reduction
    # plus the masked partial last block inside the kernel.
    pred2 = jax.random.normal(k3, (3, 5, 7, 11), dtype=jnp.float32)
    actual2 = jax.random.normal(k4, (3, 5, 7, 11), dtype=jnp.float32)
    loss2 = mse_loss(pred2, actual2)
    jax.block_until_ready(loss2)
    ref2 = jnp.mean((pred2 - actual2) ** 2)
    assert jnp.allclose(loss2, ref2, rtol=1e-5, atol=1e-6), (loss2, ref2)

    # Force a multi-block reduction plus the 2-core split with a clamped
    # duplicate block (exercises accumulation across grid steps and dup masking)
    # even on single-TensorCore chips, where the c axis is just a serial loop.
    pred3 = jax.random.normal(k5, (2, 4, 16, 24), dtype=jnp.float32)
    actual3 = jax.random.normal(k6, (2, 4, 16, 24), dtype=jnp.float32)
    loss3 = mse_loss(pred3, actual3, tile_rows=8, num_cores=2)
    jax.block_until_ready(loss3)
    ref3 = jnp.mean((pred3 - actual3) ** 2)
    assert jnp.allclose(loss3, ref3, rtol=1e-5, atol=1e-6), (loss3, ref3)

    print("KERNEL_OK")
</pallas_src>

<mosaic_0001>
module attributes {stable_mosaic.version = 11 : i64} {
  func.func @_mse_partial_kernel(%arg0: i32, %arg1: i32, %arg2: memref<16x128xf32, #tpu.memory_space<vmem>>, %arg3: memref<16x128xf32, #tpu.memory_space<vmem>>, %arg4: memref<1x1xf32, #tpu.memory_space<smem>>, %arg5: memref<8x128xf32, #tpu.memory_space<vmem>>) attributes {dimension_semantics = [#tpu.dimension_semantics<parallel>, #tpu.dimension_semantics<arbitrary>], iteration_bounds = array<i64: 1, 1>, scalar_prefetch = 0 : i64, scratch_operands = 1 : i64, tpu.core_type = #tpu.core_type<tc>, window_params = [{transform_indices = @transform_0, window_bounds = array<i64: 16, 128>}, {transform_indices = @transform_1, window_bounds = array<i64: 16, 128>}, {transform_indices = @transform_2, window_bounds = array<i64: 1, 1>}]} {
    %c0_i32 = arith.constant 0 : i32
    %0 = arith.cmpi eq, %arg1, %c0_i32 : i32
    %1 = arith.extui %0 : i1 to i32
    %c0_i32_0 = arith.constant 0 : i32
    %2 = arith.cmpi ne, %1, %c0_i32_0 : i32
    scf.if %2 {
      %cst_10 = arith.constant 0.000000e+00 : f32
      %15 = vector.broadcast %cst_10 : f32 to vector<8x128xf32>
      %c0_11 = arith.constant 0 : index
      %c0_12 = arith.constant 0 : index
      %16 = vector.load %arg5[%c0_11, %c0_12] : memref<8x128xf32, #tpu.memory_space<vmem>>, vector<8x128xf32>
      tpu.vector_store %arg5[%c0_11, %c0_12], %15 {strides = array<i32>} : memref<8x128xf32, #tpu.memory_space<vmem>>, vector<8x128xf32>,
    } else {
    }
    %c0 = arith.constant 0 : index
    %c0_1 = arith.constant 0 : index
    %3 = vector.load %arg2[%c0, %c0_1] : memref<16x128xf32, #tpu.memory_space<vmem>>, vector<16x128xf32>
    %c0_2 = arith.constant 0 : index
    %c0_3 = arith.constant 0 : index
    %4 = vector.load %arg3[%c0_2, %c0_3] : memref<16x128xf32, #tpu.memory_space<vmem>>, vector<16x128xf32>
    %5 = arith.subf %3, %4 : vector<16x128xf32>
    %6 = arith.mulf %5, %5 : vector<16x128xf32>
    %c0_4 = arith.constant 0 : index
    %c0_5 = arith.constant 0 : index
    %7 = vector.load %arg5[%c0_4, %c0_5] : memref<8x128xf32, #tpu.memory_space<vmem>>, vector<8x128xf32>
    %8 = vector.shape_cast %6 : vector<16x128xf32> to vector<2x8x128xf32>
    %cst = arith.constant dense<0.000000e+00> : vector<8x128xf32>
    %9 = vector.multi_reduction <add>, %8, %cst [0] : vector<2x8x128xf32> to vector<8x128xf32>
    %10 = arith.addf %7, %9 : vector<8x128xf32>
    %c0_6 = arith.constant 0 : index
    %c0_7 = arith.constant 0 : index
    %11 = vector.load %arg5[%c0_6, %c0_7] : memref<8x128xf32, #tpu.memory_space<vmem>>, vector<8x128xf32>
    tpu.vector_store %arg5[%c0_6, %c0_7], %10 {strides = array<i32>} : memref<8x128xf32, #tpu.memory_space<vmem>>, vector<8x128xf32>,
    %c0_i32_8 = arith.constant 0 : i32
    %12 = arith.cmpi eq, %arg1, %c0_i32_8 : i32
    %13 = arith.extui %12 : i1 to i32
    %c0_i32_9 = arith.constant 0 : i32
    %14 = arith.cmpi ne, %13, %c0_i32_9 : i32
    scf.if %14 {
      %c0_10 = arith.constant 0 : index
      %c0_11 = arith.constant 0 : index
      %15 = vector.load %arg5[%c0_10, %c0_11] : memref<8x128xf32, #tpu.memory_space<vmem>>, vector<8x128xf32>
      %16 = vector.shape_cast %15 : vector<8x128xf32> to vector<1x8x128xf32>
      %cst_12 = arith.constant dense<0.000000e+00> : vector<1xf32>
      %17 = vector.multi_reduction <add>, %16, %cst_12 [1, 2] : vector<1x8x128xf32> to vector<1xf32>
      %18 = vector.shape_cast %17 : vector<1xf32> to vector<1x1x1xf32>
      %19 = vector.extract %18[0, 0, 0] : f32 from vector<1x1x1xf32>
      %c0_13 = arith.constant 0 : index
      %c0_14 = arith.constant 0 : index
      %20 = memref.load %arg4[%c0_13, %c0_14] : memref<1x1xf32, #tpu.memory_space<smem>>
      memref.store %19, %arg4[%c0_13, %c0_14] : memref<1x1xf32, #tpu.memory_space<smem>>
    } else {
    }
    return
  }
  func.func @transform_0(%arg0: i32, %arg1: i32) -> (i32, i32) {
    %c0_i32 = arith.constant 0 : i32
    %c0_i32_0 = arith.constant 0 : i32
    return %arg1, %c0_i32 : i32, i32
  }
  func.func @transform_1(%arg0: i32, %arg1: i32) -> (i32, i32) {
    %c0_i32 = arith.constant 0 : i32
    %c0_i32_0 = arith.constant 0 : i32
    return %arg1, %c0_i32 : i32, i32
  }
  func.func @transform_2(%arg0: i32, %arg1: i32) -> (i32, i32) {
    %c0_i32 = arith.constant 0 : i32
    %c0_i32_0 = arith.constant 0 : i32
    return %arg0, %c0_i32 : i32, i32
  }
}

</mosaic_0001>

<bundles_post_ra>
// kernel: tpu_custom_call.1
= control target key start
LH: loop header
LB: loop body
LE: loop exit
PB: predicated region body
PF: predicated region fallthrough
CT: control target
= control target key end

     0   :  { %7 = vsyncpa [#allocation4], 0  ;;  %s195_s0 = inlined_call_operand.hbm [shape: f32[16,128], index: 0, kind: input, shape index: {}]   ;;  %s196_s1 = inlined_call_operand.hbm [shape: f32[16,128], index: 1, kind: input, shape index: {}]   ;;  %s197_s2 = inlined_call_operand.hbm [shape: f32[1,1], index: 2, kind: output, shape index: {}]  }
   0x1   :  { %8 = vsyncpa [#allocation7], 0 }
   0x2   :  { %9 = vsyncpa [#allocation5], 0  ;;  %s14_s11 = sshll.u32 %s195_s0, 4  ;;  %s166_s12 = smov [#allocation3]   ;;  %s15_s11 = int_to_ptr.hbm [resolvable:$true] %s14_s11 }
   0x3   :  { %s16_s13 = sshll.u32 %s166_s12, 4  ;;  %s27_s16 = sshll.u32 %s196_s1, 4  ;;  %s17_s13 = int_to_ptr.vmem [resolvable:$true] %s16_s13  ;;  %s28_s16 = int_to_ptr.hbm [resolvable:$true] %s27_s16 }
   0x4   :  { %s167_s17 = smov 128   ;;  %s168_s18 = smov 8  }
   0x5   :  { %22 = dma.hbm_to_vmem [thread:$0]  %s15_s11, 256, %s17_s13, [#allocation4], %s167_s17, %s167_s17, %s168_s18  }
   0x6   :  { %s169_s19 = smov [#allocation6]  }
   0x7   :  { %s29_s20 = sshll.u32 %s169_s19, 4  ;;  %s30_s20 = int_to_ptr.vmem [resolvable:$true] %s29_s20 }
   0x8   :  { %35 = dma.hbm_to_vmem [thread:$0]  %s28_s16, 256, %s30_s20, [#allocation7], %s167_s17, %s167_s17, %s168_s18  }
   0x9   :  { %160 = dma.done.wait [#allocation4], 256  }
   0xa   :  { %161 = vsyncadd [#allocation4], 4294967040 }
   0xb   :  { %162 = dma.done.wait [#allocation7], 256  }
   0xc   :  { %163 = vsyncadd [#allocation7], 4294967040  ;;  %v49_v0 = vld [vmem:[#allocation3] sm:$0xff]  ;;  %v50_v1 = vld [vmem:[#allocation3 + $0x8] sm:$0xff]  ;;  %s81_s21 = sshll.u32 %s197_s2, 4  ;;  %s170_s23 = smov [#allocation8]   ;;  %s82_s21 = int_to_ptr.hbm [resolvable:$true] %s81_s21 }
   0xd   :  { %v51_v2 = vld [vmem:[#allocation6] sm:$0xff]  ;;  %v52_v3 = vld [vmem:[#allocation6 + $0x8] sm:$0xff] }
   0xe   :  { %v53_v4 = vsub.f32 %v49_v0, %v51_v2  ;;  %v54_v5 = vsub.f32 %v50_v1, %v52_v3 }
  0x10   :  { %v55_v6 = vmul.f32 %v53_v4, %v53_v4  ;;  %v56_v7 = vmul.f32 %v54_v5, %v54_v5 }
  0x12   :  { %v58_v8 = vadd.f32 %v56_v7, %v55_v6 }
  0x14   :  { %65 = vadd.xlane.f32.xlu0 %v58_v8 }
  0x87   :  { %v66_v9 = vpop.xlane.xlu0 %65 }
  0x88   :  { %v67_v10 = vrot.slane %v66_v9, 4 }
  0x8a   :  { %v68_v11 = vadd.f32 %v67_v10, %v66_v9 }
  0x8c   :  { %v69_v12 = vrot.slane %v68_v11, 2 }
  0x8e   :  { %v70_v13 = vadd.f32 %v69_v12, %v68_v11 }
  0x90   :  { %v71_v14 = vrot.slane %v70_v13, 1 }
  0x92   :  { %v72_v15 = vadd.f32 %v71_v14, %v70_v13 }
  0x94   :  { %93 = vpush %v72_v15 }
  0xc5   :  { %s94_s22 = spop %93 }
  0xc6   :  { %75 = sst [smem:[#allocation8]] %s94_s22 }
  0xc7   :  { %84 = dma.smem_to_hbm %s170_s23, 16, %s82_s21, [#allocation5]  }
  0xc8   :  { %164 = dma.done.wait [#allocation5], 16  }
  0xc9   :  { %165 = vsyncadd [#allocation5], 4294967280 }
  0xca   :  { %89 = sfence }
  0xcb   :  { %90 = vsyncpa [#allocation4], 1 }
  0xcc   :  { %91 = vsyncpa [#allocation7], 1 }
  0xcd   :  { %92 = vsyncpa [#allocation5], 1 }

</bundles_post_ra>
